<compile_context>
chip_gen: v7x
topology: tpu7x:2x2x1
jax: 0.10.0
libtpu: 0.0.40
codegen_flags: <defaults>
</compile_context>

<pallas_src>
import jax
import jax.numpy as jnp
from jax import lax
from jax.experimental import pallas as pl
from jax.experimental.pallas import tpu as pltpu

_EPS = 1e-5
_VMEM_LIMIT = 32 * 1024 * 1024  # explicit scoped-VMEM budget (<= physical on all gens)


def ln_qkv_kernel(x_ref, gamma_ref, beta_ref, wqkv_ref, bqkv_ref, qkv_ref):
    # x_ref: (TR, H) f32 rows of the stacked (V*S, H) slab.
    x = x_ref[...]
    mu = jnp.mean(x, axis=-1, keepdims=True)
    xc = x - mu
    var = jnp.mean(xc * xc, axis=-1, keepdims=True)        # two-pass: stable
    y = xc * lax.rsqrt(var + _EPS) * gamma_ref[...] + beta_ref[...]
    # One fused Q|K|V projection: bf16 MXU operands, f32 accumulation.
    qkv = jnp.dot(y.astype(jnp.bfloat16), wqkv_ref[...],
                  preferred_element_type=jnp.float32)
    qkv_ref[...] = qkv + bqkv_ref[...]


def attn_kernel(x_ref, q_ref, k_ref, v_ref, bias_ref, wo_ref, bo_ref, out_ref):
    V, TQ, H = x_ref.shape
    A = q_ref.shape[-1]
    scale = float(A) ** -0.5

    # Residual term: torch.mean(x, dim=0) over the view axis (original x).
    mean_x = jnp.mean(x_ref[...], axis=0)                   # (TQ, H)

    q = (q_ref[...] * scale).astype(jnp.bfloat16)           # (V, TQ, A)
    k = k_ref[...].astype(jnp.bfloat16)                     # (V, S,  A)
    v = v_ref[...].astype(jnp.bfloat16)                     # (V, S,  A)

    # Batched-over-views scores (f32 accumulation on the MXU).
    s = jnp.einsum('vqa,vka->vqk', q, k,
                   preferred_element_type=jnp.float32)      # (V, TQ, S)
    s = s - jnp.max(s, axis=-1, keepdims=True)
    e = jnp.exp(s)
    denom = jnp.sum(e, axis=-1, keepdims=True)
    p = e * pl.reciprocal(denom, approx=True)               # divide -> EUP slot
    # The PyTorch module adds attn_bias AFTER the softmax.
    p = p + bias_ref[...]

    ctx = jnp.einsum('vqk,vka->vqa', p.astype(jnp.bfloat16), v,
                     preferred_element_type=jnp.float32)    # (V, TQ, A)

    # Output projection with no per-view Python loop: batched matmul against
    # the per-view block rows of W_out^T, reduced over V.  Mathematically the
    # fused (TQ, V*A) @ (V*A, H) dot.
    outv = jnp.einsum('vqa,vah->vqh', ctx.astype(jnp.bfloat16), wo_ref[...],
                      preferred_element_type=jnp.float32)   # (V, TQ, H)
    out_ref[...] = mean_x + jnp.sum(outv, axis=0) + bo_ref[...]


def _pick_tile(n, cap):
    """Largest tile <= cap that divides n and keeps the (8,128) rule happy."""
    for t in (cap, cap // 2, cap // 4, 128, 64, 32, 16, 8):
        if t <= n and n % t == 0:
            return t
    return n  # fall back to the full dimension (always legal)


def encoder_forward(x, params, bias=None):
    V, S, H = x.shape
    A = H // V
    gamma, beta, wq, bq, wk, bk, wv, bv, wo, bo = params
    if bias is None:
        bias = jnp.zeros((V, S, S), jnp.float32)
    bias = bias.astype(jnp.float32)

    # Wrapper-side weight packing (free, outside the kernels).
    wqkv = jnp.concatenate([wq, wk, wv], axis=1).astype(jnp.bfloat16)   # (H, 3A)
    bqkv = jnp.concatenate([bq, bk, bv], axis=1).astype(jnp.float32)    # (1, 3A)
    wo3 = wo.reshape(V, A, H).astype(jnp.bfloat16)                      # (V, A, H)

    # ---- Kernel 1: LayerNorm + fused QKV projection over the stacked slab --
    rows = V * S
    TR = _pick_tile(rows, 256)
    x2d = x.reshape(rows, H)

    qkv = pl.pallas_call(
        ln_qkv_kernel,
        out_shape=jax.ShapeDtypeStruct((rows, 3 * A), jnp.float32),
        grid=(rows // TR,),
        in_specs=[
            pl.BlockSpec((TR, H), lambda i: (i, 0)),
            pl.BlockSpec((1, H), lambda i: (0, 0)),
            pl.BlockSpec((1, H), lambda i: (0, 0)),
            pl.BlockSpec((H, 3 * A), lambda i: (0, 0)),
            pl.BlockSpec((1, 3 * A), lambda i: (0, 0)),
        ],
        out_specs=pl.BlockSpec((TR, 3 * A), lambda i: (i, 0)),
        compiler_params=pltpu.CompilerParams(
            dimension_semantics=("parallel",),
            vmem_limit_bytes=_VMEM_LIMIT),
    )(x2d, gamma, beta, wqkv, bqkv)

    qkv = qkv.reshape(V, S, 3 * A)
    q = qkv[..., :A]
    k = qkv[..., A:2 * A]
    v = qkv[..., 2 * A:]

    # ---- Kernel 2: attention + output projection, tiled over the query axis -
    TQ = _pick_tile(S, 128)

    out = pl.pallas_call(
        attn_kernel,
        out_shape=jax.ShapeDtypeStruct((S, H), jnp.float32),
        grid=(S // TQ,),
        in_specs=[
            pl.BlockSpec((V, TQ, H), lambda i: (0, i, 0)),   # x (residual) tile
            pl.BlockSpec((V, TQ, A), lambda i: (0, i, 0)),   # q tile
            pl.BlockSpec((V, S, A), lambda i: (0, 0, 0)),    # k (full seq)
            pl.BlockSpec((V, S, A), lambda i: (0, 0, 0)),    # v (full seq)
            pl.BlockSpec((V, TQ, S), lambda i: (0, i, 0)),   # bias tile
            pl.BlockSpec((V, A, H), lambda i: (0, 0, 0)),    # W_out^T block rows
            pl.BlockSpec((1, H), lambda i: (0, 0)),          # b_out
        ],
        out_specs=pl.BlockSpec((TQ, H), lambda i: (i, 0)),
        compiler_params=pltpu.CompilerParams(
            dimension_semantics=("parallel",),
            vmem_limit_bytes=_VMEM_LIMIT),
    )(x, q, k, v, bias, wo3, bo)
    return out


def init_params(key, H, V):
    A = H // V
    ks = jax.random.split(key, 10)
    gamma = 1.0 + 0.1 * jax.random.normal(ks[0], (1, H), jnp.float32)
    beta = 0.1 * jax.random.normal(ks[1], (1, H), jnp.float32)

    def lin(kw, kb, din, dout):
        lim = 1.0 / (din ** 0.5)
        w = jax.random.uniform(kw, (din, dout), jnp.float32, -lim, lim)  # = W^T
        b = jax.random.uniform(kb, (1, dout), jnp.float32, -lim, lim)
        return w, b

    wq, bq = lin(ks[2], ks[3], H, A)
    wk, bk = lin(ks[4], ks[5], H, A)
    wv, bv = lin(ks[6], ks[7], H, A)
    wo, bo = lin(ks[8], ks[9], V * A, H)
    return (gamma, beta, wq, bq, wk, bk, wv, bv, wo, bo)


def encoder_reference(x, params, bias=None, mxu_dtype=jnp.float32):
    """Pure-JAX reference mirroring the PyTorch forward.

    With mxu_dtype=bfloat16 it applies the same matmul-operand casts the
    kernel uses (f32 accumulation everywhere), enabling a tight comparison.
    """
    V, S, H = x.shape
    A = H // V
    gamma, beta, wq, bq, wk, bk, wv, bv, wo, bo = params
    if bias is None:
        bias = jnp.zeros((V, S, S), jnp.float32)
    c = lambda a: a.astype(mxu_dtype)

    mu = jnp.mean(x, axis=-1, keepdims=True)
    xc = x - mu
    var = jnp.mean(xc * xc, axis=-1, keepdims=True)
    y = xc * lax.rsqrt(var + _EPS) * gamma.reshape(1, 1, H) + beta.reshape(1, 1, H)

    def proj(w, b):
        return jnp.einsum('vsh,ha->vsa', c(y), c(w),
                          preferred_element_type=jnp.float32) + b.reshape(1, 1, -1)

    q = proj(wq, bq)
    k = proj(wk, bk)
    v = proj(wv, bv)
    s = jnp.einsum('vsa,vta->vst', c(q * (A ** -0.5)), c(k),
                   preferred_element_type=jnp.float32)
    attn = jax.nn.softmax(s, axis=2) + bias          # bias AFTER softmax
    ctx = jnp.einsum('vst,vta->vsa', c(attn), c(v),
                     preferred_element_type=jnp.float32)
    ctx2 = jnp.transpose(ctx, (1, 0, 2)).reshape(S, V * A)
    out = jnp.einsum('sa,ah->sh', c(ctx2), c(wo),
                     preferred_element_type=jnp.float32)
    return jnp.mean(x, axis=0) + out + bo.reshape(1, H)


if __name__ == "__main__":
    key = jax.random.PRNGKey(0)
    V, S, H = 4, 8, 32          # view_size=4, seq=8, hidden=32 -> att_size=8
    kx, kb, kp = jax.random.split(key, 3)
    x = jax.random.normal(kx, (V, S, H), jnp.float32)
    bias = 0.01 * jax.random.normal(kb, (V, S, S), jnp.float32)
    params = init_params(kp, H, V)

    fwd = jax.jit(encoder_forward)
    out = jax.block_until_ready(fwd(x, params, bias))

    ref_bf16 = encoder_reference(x, params, bias, mxu_dtype=jnp.bfloat16)
    ref_f32 = encoder_reference(x, params, bias, mxu_dtype=jnp.float32)

    assert out.shape == (S, H), out.shape
    err16 = float(jnp.max(jnp.abs(out - ref_bf16)))
    err32 = float(jnp.max(jnp.abs(out - ref_f32)))
    # Tight check vs a reference that uses the same bf16 MXU-operand casts.
    assert jnp.allclose(out, ref_bf16, atol=1e-2, rtol=1e-2), err16
    # Looser sanity check vs the exact f32 module semantics.
    assert jnp.allclose(out, ref_f32, atol=1e-1, rtol=1e-1), err32
    print("KERNEL_OK")
</pallas_src>

<mosaic_0001>
module attributes {stable_mosaic.version = 11 : i64} {
  func.func @ln_qkv_kernel(%arg0: i32, %arg1: memref<32x32xf32, #tpu.memory_space<vmem>>, %arg2: memref<1x32xf32, #tpu.memory_space<vmem>>, %arg3: memref<1x32xf32, #tpu.memory_space<vmem>>, %arg4: memref<32x24xbf16, #tpu.memory_space<vmem>>, %arg5: memref<1x24xf32, #tpu.memory_space<vmem>>, %arg6: memref<32x24xf32, #tpu.memory_space<vmem>>) attributes {dimension_semantics = [#tpu.dimension_semantics<parallel>], iteration_bounds = array<i64: 1>, scalar_prefetch = 0 : i64, scratch_operands = 0 : i64, tpu.core_type = #tpu.core_type<tc>, window_params = [{transform_indices = @transform_0, window_bounds = array<i64: 32, 32>}, {pipeline_mode = #tpu.pipeline_mode<synchronous>, transform_indices = @transform_1, window_bounds = array<i64: 1, 32>}, {pipeline_mode = #tpu.pipeline_mode<synchronous>, transform_indices = @transform_2, window_bounds = array<i64: 1, 32>}, {pipeline_mode = #tpu.pipeline_mode<synchronous>, transform_indices = @transform_3, window_bounds = array<i64: 32, 24>}, {pipeline_mode = #tpu.pipeline_mode<synchronous>, transform_indices = @transform_4, window_bounds = array<i64: 1, 24>}, {transform_indices = @transform_5, window_bounds = array<i64: 32, 24>}]} {
    %c0 = arith.constant 0 : index
    %c0_0 = arith.constant 0 : index
    %0 = vector.load %arg1[%c0, %c0_0] : memref<32x32xf32, #tpu.memory_space<vmem>>, vector<32x32xf32>
    %cst = arith.constant dense<0.000000e+00> : vector<32xf32>
    %1 = vector.multi_reduction <add>, %0, %cst [1] : vector<32x32xf32> to vector<32xf32>
    %2 = vector.shape_cast %1 : vector<32xf32> to vector<32x1xf32>
    %cst_1 = arith.constant 3.200000e+01 : f32
    %3 = vector.broadcast %cst_1 : f32 to vector<32x1xf32>
    %4 = arith.divf %2, %3 : vector<32x1xf32>
    %5 = vector.broadcast %4 : vector<32x1xf32> to vector<32x32xf32>
    %6 = arith.subf %0, %5 : vector<32x32xf32>
    %7 = arith.mulf %6, %6 : vector<32x32xf32>
    %cst_2 = arith.constant dense<0.000000e+00> : vector<32xf32>
    %8 = vector.multi_reduction <add>, %7, %cst_2 [1] : vector<32x32xf32> to vector<32xf32>
    %9 = vector.shape_cast %8 : vector<32xf32> to vector<32x1xf32>
    %cst_3 = arith.constant 3.200000e+01 : f32
    %10 = vector.broadcast %cst_3 : f32 to vector<32x1xf32>
    %11 = arith.divf %9, %10 : vector<32x1xf32>
    %cst_4 = arith.constant 9.99999974E-6 : f32
    %12 = vector.broadcast %cst_4 : f32 to vector<32x1xf32>
    %13 = arith.addf %11, %12 : vector<32x1xf32>
    %14 = math.rsqrt %13 : vector<32x1xf32>
    %15 = vector.broadcast %14 : vector<32x1xf32> to vector<32x32xf32>
    %16 = arith.mulf %6, %15 : vector<32x32xf32>
    %c0_5 = arith.constant 0 : index
    %c0_6 = arith.constant 0 : index
    %17 = vector.load %arg2[%c0_5, %c0_6] : memref<1x32xf32, #tpu.memory_space<vmem>>, vector<1x32xf32>
    %18 = vector.broadcast %17 : vector<1x32xf32> to vector<32x32xf32>
    %19 = arith.mulf %16, %18 : vector<32x32xf32>
    %c0_7 = arith.constant 0 : index
    %c0_8 = arith.constant 0 : index
    %20 = vector.load %arg3[%c0_7, %c0_8] : memref<1x32xf32, #tpu.memory_space<vmem>>, vector<1x32xf32>
    %21 = vector.broadcast %20 : vector<1x32xf32> to vector<32x32xf32>
    %22 = arith.addf %19, %21 : vector<32x32xf32>
    %23 = arith.truncf %22 : vector<32x32xf32> to vector<32x32xbf16>
    %c0_9 = arith.constant 0 : index
    %c0_10 = arith.constant 0 : index
    %24 = vector.load %arg4[%c0_9, %c0_10] : memref<32x24xbf16, #tpu.memory_space<vmem>>, vector<32x24xbf16>
    %cst_11 = arith.constant dense<0.000000e+00> : vector<32x24xf32>
    %25 = tpu.matmul %23, %24, %cst_11 {dimension_numbers = #tpu.dot_dimension_numbers<[1], [0], [0], [1], [0, 0, 1, 1], [], []>} : vector<32x32xbf16>, vector<32x24xbf16>, vector<32x24xf32> -> vector<32x24xf32>
    %c0_12 = arith.constant 0 : index
    %c0_13 = arith.constant 0 : index
    %26 = vector.load %arg5[%c0_12, %c0_13] : memref<1x24xf32, #tpu.memory_space<vmem>>, vector<1x24xf32>
    %27 = vector.broadcast %26 : vector<1x24xf32> to vector<32x24xf32>
    %28 = arith.addf %25, %27 : vector<32x24xf32>
    %c0_14 = arith.constant 0 : index
    %c0_15 = arith.constant 0 : index
    %29 = vector.load %arg6[%c0_14, %c0_15] : memref<32x24xf32, #tpu.memory_space<vmem>>, vector<32x24xf32>
    tpu.vector_store %arg6[%c0_14, %c0_15], %28 {strides = array<i32>} : memref<32x24xf32, #tpu.memory_space<vmem>>, vector<32x24xf32>,
    return
  }
  func.func @transform_0(%arg0: i32) -> (i32, i32) {
    %c0_i32 = arith.constant 0 : i32
    %c0_i32_0 = arith.constant 0 : i32
    return %arg0, %c0_i32 : i32, i32
  }
  func.func @transform_1(%arg0: i32) -> (i32, i32) {
    %c0_i32 = arith.constant 0 : i32
    %c0_i32_0 = arith.constant 0 : i32
    %c0_i32_1 = arith.constant 0 : i32
    return %c0_i32, %c0_i32_0 : i32, i32
  }
  func.func @transform_2(%arg0: i32) -> (i32, i32) {
    %c0_i32 = arith.constant 0 : i32
    %c0_i32_0 = arith.constant 0 : i32
    %c0_i32_1 = arith.constant 0 : i32
    return %c0_i32, %c0_i32_0 : i32, i32
  }
  func.func @transform_3(%arg0: i32) -> (i32, i32) {
    %c0_i32 = arith.constant 0 : i32
    %c0_i32_0 = arith.constant 0 : i32
    %c0_i32_1 = arith.constant 0 : i32
    return %c0_i32, %c0_i32_0 : i32, i32
  }
  func.func @transform_4(%arg0: i32) -> (i32, i32) {
    %c0_i32 = arith.constant 0 : i32
    %c0_i32_0 = arith.constant 0 : i32
    %c0_i32_1 = arith.constant 0 : i32
    return %c0_i32, %c0_i32_0 : i32, i32
  }
  func.func @transform_5(%arg0: i32) -> (i32, i32) {
    %c0_i32 = arith.constant 0 : i32
    %c0_i32_0 = arith.constant 0 : i32
    return %arg0, %c0_i32 : i32, i32
  }
}

module attributes {stable_mosaic.version = 11 : i64} {
  func.func @attn_kernel(%arg0: i32, %arg1: memref<4x8x32xf32, #tpu.memory_space<vmem>>, %arg2: memref<4x8x8xf32, #tpu.memory_space<vmem>>, %arg3: memref<4x8x8xf32, #tpu.memory_space<vmem>>, %arg4: memref<4x8x8xf32, #tpu.memory_space<vmem>>, %arg5: memref<4x8x8xf32, #tpu.memory_space<vmem>>, %arg6: memref<4x8x32xbf16, #tpu.memory_space<vmem>>, %arg7: memref<1x32xf32, #tpu.memory_space<vmem>>, %arg8: memref<8x32xf32, #tpu.memory_space<vmem>>) attributes {dimension_semantics = [#tpu.dimension_semantics<parallel>], iteration_bounds = array<i64: 1>, scalar_prefetch = 0 : i64, scratch_operands = 0 : i64, tpu.core_type = #tpu.core_type<tc>, window_params = [{transform_indices = @transform_0, window_bounds = array<i64: 4, 8, 32>}, {transform_indices = @transform_1, window_bounds = array<i64: 4, 8, 8>}, {pipeline_mode = #tpu.pipeline_mode<synchronous>, transform_indices = @transform_2, window_bounds = array<i64: 4, 8, 8>}, {pipeline_mode = #tpu.pipeline_mode<synchronous>, transform_indices = @transform_3, window_bounds = array<i64: 4, 8, 8>}, {transform_indices = @transform_4, window_bounds = array<i64: 4, 8, 8>}, {pipeline_mode = #tpu.pipeline_mode<synchronous>, transform_indices = @transform_5, window_bounds = array<i64: 4, 8, 32>}, {pipeline_mode = #tpu.pipeline_mode<synchronous>, transform_indices = @transform_6, window_bounds = array<i64: 1, 32>}, {transform_indices = @transform_7, window_bounds = array<i64: 8, 32>}]} {
    %c0 = arith.constant 0 : index
    %c0_0 = arith.constant 0 : index
    %c0_1 = arith.constant 0 : index
    %0 = vector.load %arg1[%c0, %c0_0, %c0_1] : memref<4x8x32xf32, #tpu.memory_space<vmem>>, vector<4x8x32xf32>
    %cst = arith.constant dense<0.000000e+00> : vector<8x32xf32>
    %1 = vector.multi_reduction <add>, %0, %cst [0] : vector<4x8x32xf32> to vector<8x32xf32>
    %cst_2 = arith.constant 4.000000e+00 : f32
    %2 = vector.broadcast %cst_2 : f32 to vector<8x32xf32>
    %3 = arith.divf %1, %2 : vector<8x32xf32>
    %c0_3 = arith.constant 0 : index
    %c0_4 = arith.constant 0 : index
    %c0_5 = arith.constant 0 : index
    %4 = vector.load %arg2[%c0_3, %c0_4, %c0_5] : memref<4x8x8xf32, #tpu.memory_space<vmem>>, vector<4x8x8xf32>
    %cst_6 = arith.constant 0.353553385 : f32
    %5 = vector.broadcast %cst_6 : f32 to vector<4x8x8xf32>
    %6 = arith.mulf %4, %5 : vector<4x8x8xf32>
    %7 = arith.truncf %6 : vector<4x8x8xf32> to vector<4x8x8xbf16>
    %c0_7 = arith.constant 0 : index
    %c0_8 = arith.constant 0 : index
    %c0_9 = arith.constant 0 : index
    %8 = vector.load %arg3[%c0_7, %c0_8, %c0_9] : memref<4x8x8xf32, #tpu.memory_space<vmem>>, vector<4x8x8xf32>
    %9 = arith.truncf %8 : vector<4x8x8xf32> to vector<4x8x8xbf16>
    %c0_10 = arith.constant 0 : index
    %c0_11 = arith.constant 0 : index
    %c0_12 = arith.constant 0 : index
    %10 = vector.load %arg4[%c0_10, %c0_11, %c0_12] : memref<4x8x8xf32, #tpu.memory_space<vmem>>, vector<4x8x8xf32>
    %11 = arith.truncf %10 : vector<4x8x8xf32> to vector<4x8x8xbf16>
    "tpu.trace_start"() <{level = 10 : i32, message = "vqa,vka->vqk"}> : () -> ()
    %cst_13 = arith.constant dense<0.000000e+00> : vector<4x8x8xf32>
    %12 = tpu.matmul %7, %9, %cst_13 {dimension_numbers = #tpu.dot_dimension_numbers<[2], [2], [1], [1], [0, 0, 0, 1, 1, 1], [0], [0]>} : vector<4x8x8xbf16>, vector<4x8x8xbf16>, vector<4x8x8xf32> -> vector<4x8x8xf32>
    "tpu.trace_stop"() : () -> ()
    %cst_14 = arith.constant dense<0xFF800000> : vector<4x8xf32>
    %13 = vector.multi_reduction <maximumf>, %12, %cst_14 [2] : vector<4x8x8xf32> to vector<4x8xf32>
    %14 = vector.shape_cast %13 : vector<4x8xf32> to vector<4x8x1xf32>
    %15 = vector.broadcast %14 : vector<4x8x1xf32> to vector<4x8x8xf32>
    %16 = arith.subf %12, %15 : vector<4x8x8xf32>
    %17 = math.exp %16 : vector<4x8x8xf32>
    %cst_15 = arith.constant dense<0.000000e+00> : vector<4x8xf32>
    %18 = vector.multi_reduction <add>, %17, %cst_15 [2] : vector<4x8x8xf32> to vector<4x8xf32>
    %19 = vector.shape_cast %18 : vector<4x8xf32> to vector<4x8x1xf32>
    %20 = tpu.reciprocal %19 {approx = true} : vector<4x8x1xf32> -> vector<4x8x1xf32>
    %21 = vector.broadcast %20 : vector<4x8x1xf32> to vector<4x8x8xf32>
    %22 = arith.mulf %17, %21 : vector<4x8x8xf32>
    %c0_16 = arith.constant 0 : index
    %c0_17 = arith.constant 0 : index
    %c0_18 = arith.constant 0 : index
    %23 = vector.load %arg5[%c0_16, %c0_17, %c0_18] : memref<4x8x8xf32, #tpu.memory_space<vmem>>, vector<4x8x8xf32>
    %24 = arith.addf %22, %23 : vector<4x8x8xf32>
    %25 = arith.truncf %24 : vector<4x8x8xf32> to vector<4x8x8xbf16>
    "tpu.trace_start"() <{level = 10 : i32, message = "vqk,vka->vqa"}> : () -> ()
    %cst_19 = arith.constant dense<0.000000e+00> : vector<4x8x8xf32>
    %26 = tpu.matmul %25, %11, %cst_19 {dimension_numbers = #tpu.dot_dimension_numbers<[2], [1], [1], [2], [0, 0, 0, 1, 1, 2], [0], [0]>} : vector<4x8x8xbf16>, vector<4x8x8xbf16>, vector<4x8x8xf32> -> vector<4x8x8xf32>
    "tpu.trace_stop"() : () -> ()
    %27 = arith.truncf %26 : vector<4x8x8xf32> to vector<4x8x8xbf16>
    %c0_20 = arith.constant 0 : index
    %c0_21 = arith.constant 0 : index
    %c0_22 = arith.constant 0 : index
    %28 = vector.load %arg6[%c0_20, %c0_21, %c0_22] : memref<4x8x32xbf16, #tpu.memory_space<vmem>>, vector<4x8x32xbf16>
    "tpu.trace_start"() <{level = 10 : i32, message = "vqa,vah->vqh"}> : () -> ()
    %cst_23 = arith.constant dense<0.000000e+00> : vector<4x8x32xf32>
    %29 = tpu.matmul %27, %28, %cst_23 {dimension_numbers = #tpu.dot_dimension_numbers<[2], [1], [1], [2], [0, 0, 0, 1, 1, 2], [0], [0]>} : vector<4x8x8xbf16>, vector<4x8x32xbf16>, vector<4x8x32xf32> -> vector<4x8x32xf32>
    "tpu.trace_stop"() : () -> ()
    %cst_24 = arith.constant dense<0.000000e+00> : vector<8x32xf32>
    %30 = vector.multi_reduction <add>, %29, %cst_24 [0] : vector<4x8x32xf32> to vector<8x32xf32>
    %31 = arith.addf %3, %30 : vector<8x32xf32>
    %c0_25 = arith.constant 0 : index
    %c0_26 = arith.constant 0 : index
    %32 = vector.load %arg7[%c0_25, %c0_26] : memref<1x32xf32, #tpu.memory_space<vmem>>, vector<1x32xf32>
    %33 = vector.broadcast %32 : vector<1x32xf32> to vector<8x32xf32>
    %34 = arith.addf %31, %33 : vector<8x32xf32>
    %c0_27 = arith.constant 0 : index
    %c0_28 = arith.constant 0 : index
    %35 = vector.load %arg8[%c0_27, %c0_28] : memref<8x32xf32, #tpu.memory_space<vmem>>, vector<8x32xf32>
    tpu.vector_store %arg8[%c0_27, %c0_28], %34 {strides = array<i32>} : memref<8x32xf32, #tpu.memory_space<vmem>>, vector<8x32xf32>,
    return
  }
  func.func @transform_0(%arg0: i32) -> (i32, i32, i32) {
    %c0_i32 = arith.constant 0 : i32
    %c0_i32_0 = arith.constant 0 : i32
    %c0_i32_1 = arith.constant 0 : i32
    return %c0_i32, %arg0, %c0_i32_0 : i32, i32, i32
  }
  func.func @transform_1(%arg0: i32) -> (i32, i32, i32) {
    %c0_i32 = arith.constant 0 : i32
    %c0_i32_0 = arith.constant 0 : i32
    %c0_i32_1 = arith.constant 0 : i32
    return %c0_i32, %arg0, %c0_i32_0 : i32, i32, i32
  }
  func.func @transform_2(%arg0: i32) -> (i32, i32, i32) {
    %c0_i32 = arith.constant 0 : i32
    %c0_i32_0 = arith.constant 0 : i32
    %c0_i32_1 = arith.constant 0 : i32
    %c0_i32_2 = arith.constant 0 : i32
    return %c0_i32, %c0_i32_0, %c0_i32_1 : i32, i32, i32
  }
  func.func @transform_3(%arg0: i32) -> (i32, i32, i32) {
    %c0_i32 = arith.constant 0 : i32
    %c0_i32_0 = arith.constant 0 : i32
    %c0_i32_1 = arith.constant 0 : i32
    %c0_i32_2 = arith.constant 0 : i32
    return %c0_i32, %c0_i32_0, %c0_i32_1 : i32, i32, i32
  }
  func.func @transform_4(%arg0: i32) -> (i32, i32, i32) {
    %c0_i32 = arith.constant 0 : i32
    %c0_i32_0 = arith.constant 0 : i32
    %c0_i32_1 = arith.constant 0 : i32
    return %c0_i32, %arg0, %c0_i32_0 : i32, i32, i32
  }
  func.func @transform_5(%arg0: i32) -> (i32, i32, i32) {
    %c0_i32 = arith.constant 0 : i32
    %c0_i32_0 = arith.constant 0 : i32
    %c0_i32_1 = arith.constant 0 : i32
    %c0_i32_2 = arith.constant 0 : i32
    return %c0_i32, %c0_i32_0, %c0_i32_1 : i32, i32, i32
  }
  func.func @transform_6(%arg0: i32) -> (i32, i32) {
    %c0_i32 = arith.constant 0 : i32
    %c0_i32_0 = arith.constant 0 : i32
    %c0_i32_1 = arith.constant 0 : i32
    return %c0_i32, %c0_i32_0 : i32, i32
  }
  func.func @transform_7(%arg0: i32) -> (i32, i32) {
    %c0_i32 = arith.constant 0 : i32
    %c0_i32_0 = arith.constant 0 : i32
    return %arg0, %c0_i32 : i32, i32
  }
}

</mosaic_0001>

<bundles_post_ra>
// kernel: encoder_forward.2
= control target key start
LH: loop header
LB: loop body
LE: loop exit
PB: predicated region body
PF: predicated region fallthrough
CT: control target
= control target key end

     0   :  { %vm25_vm0 = vcmask 261120   ;;  %vm181_vm1 = vcmask 195584   ;;  %s298_s0 = inlined_call_operand.vmem [shape: f32[32,32], index: 0, kind: input, shape index: {}]   ;;  %s299_s3 = inlined_call_operand.vmem [shape: bf16[32,24], index: 3, kind: input, shape index: {}]   ;;  %s300_s1 = inlined_call_operand.vmem [shape: f32[1,32], index: 1, kind: input, shape index: {}]   ;;  %s301_s2 = inlined_call_operand.vmem [shape: f32[1,32], index: 2, kind: input, shape index: {}]   ;;  %s302_s4 = inlined_call_operand.vmem [shape: f32[1,24], index: 4, kind: input, shape index: {}]   ;;  %s303_s5 = inlined_call_operand.vmem [shape: f32[32,24], index: 5, kind: output, shape index: {}]  }
   0x1   :  { %v21_v0 = vld [vmem:[%s298_s0] sm:$0xff]  ;;  %v23_v1 = vld [vmem:[%s298_s0 + $0x10] sm:$0xff]  ;;  %v22_v2 = vld [vmem:[%s298_s0 + $0x8] sm:$0xff] }
   0x2   :  { %v26_v3 = vsel %vm25_vm0, %v21_v0, 0.0  ;;  %v32_v4 = vsel %vm25_vm0, %v23_v1, 0.0  ;;  %v24_v5 = vld [vmem:[%s298_s0 + $0x18] sm:$0xff]  ;;  %v29_v6 = vsel %vm25_vm0, %v22_v2, 0.0  ;;  %v209_v28 = vld [vmem:[%s299_s3] sm:$0xff]   ;;  %v210_v29 = vld [vmem:[%s299_s3 + $0x8] sm:$0xff]  }
   0x3   :  { %27 = vadd.xlane.f32.xlu0 %v26_v3  ;;  %33 = vadd.xlane.f32.xlu1 %v32_v4  ;;  %v35_v7 = vsel %vm25_vm0, %v24_v5, 0.0  ;;  %v190_v44 = vld [vmem:[%s300_s1] ss:$0 sm:$0xff] }
   0x4   :  { %201 = vmatprep.subr.bf16.mxu0 %v209_v28  ;;  %v191_v50 = vld [vmem:[%s301_s2] ss:$0 sm:$0xff] }
   0x5   :  { %202 = vmatpush3.bf16.msra.mxu0 %v209_v28  ;;  %v192_v62 = vld [vmem:[%s302_s4] ss:$0 sm:$0xff] }
   0x6   :  { %203 = vmatprep.subr.bf16.mxu0 %v210_v29 }
   0x7   :  { %30 = vadd.xlane.f32.xlu0 %v29_v6  ;;  %36 = vadd.xlane.f32.xlu1 %v35_v7 }
   0x9   :  { %204 = vmatpush3.bf16.msra.mxu0 %v210_v29 }
  0x90   :  { %v28_v8 = vpop.xlane.xlu0 %27  ;;  %v34_v9 = vpop.xlane.xlu1 %33 }
  0x91   :  { %v39_v10 = vmul.f32 0.03125, %v28_v8  ;;  %v41_v11 = vmul.f32 0.03125, %v34_v9 }
  0x93   :  { %v43_v12 = vsub.f32 %v21_v0, %v39_v10  ;;  %v45_v13 = vsub.f32 %v23_v1, %v41_v11 }
  0x94   :  { %v31_v14 = vpop.xlane.xlu0 %30  ;;  %v37_v15 = vpop.xlane.xlu1 %36 }
  0x95   :  { %v40_v16 = vmul.f32 0.03125, %v31_v14  ;;  %v42_v17 = vmul.f32 0.03125, %v37_v15  ;;  %v47_v18 = vmul.f32 %v43_v12, %v43_v12  ;;  %v49_v19 = vmul.f32 %v45_v13, %v45_v13 }
  0x97   :  { %v44_v20 = vsub.f32 %v22_v2, %v40_v16  ;;  %v46_v21 = vsub.f32 %v24_v5, %v42_v17  ;;  %v51_v22 = vsel %vm25_vm0, %v47_v18, 0.0  ;;  %v57_v23 = vsel %vm25_vm0, %v49_v19, 0.0 }
  0x98   :  { %52 = vadd.xlane.f32.xlu0 %v51_v22 }
  0x99   :  { %v48_v24 = vmul.f32 %v44_v20, %v44_v20  ;;  %v50_v25 = vmul.f32 %v46_v21, %v46_v21 }
  0x9b   :  { %v54_v26 = vsel %vm25_vm0, %v48_v24, 0.0  ;;  %v60_v27 = vsel %vm25_vm0, %v50_v25, 0.0 }
  0x9c   :  { %58 = vadd.xlane.f32.xlu0 %v57_v23  ;;  %55 = vadd.xlane.f32.xlu1 %v54_v26 }
  0xa0   :  { %61 = vadd.xlane.f32.xlu1 %v60_v27 }
 0x125   :  { %v53_v30 = vpop.xlane.xlu0 %52 }
 0x126   :  { %v63_v31 = vmul.f32 0.03125, %v53_v30 }
 0x128   :  { %v67_v32 = vadd.f32 1e-05, %v63_v31 }
 0x129   :  { %v56_v33 = vpop.xlane.xlu1 %55  ;;  %v59_v34 = vpop.xlane.xlu0 %58 }
 0x12a   :  { %211 = vrsqrt.f32 %v67_v32  ;;  %v64_v35 = vmul.f32 0.03125, %v56_v33  ;;  %v65_v36 = vmul.f32 0.03125, %v59_v34 }
 0x12c   :  { %v68_v37 = vadd.f32 1e-05, %v64_v35  ;;  %v69_v38 = vadd.f32 1e-05, %v65_v36 }
 0x12d   :  { %v62_v39 = vpop.xlane.xlu1 %61 }
 0x12e   :  { %213 = vrsqrt.f32 %v68_v37  ;;  %v66_v40 = vmul.f32 0.03125, %v62_v39 }
 0x12f   :  { %215 = vrsqrt.f32 %v69_v38 }
 0x130   :  { %v70_v41 = vadd.f32 1e-05, %v66_v40 }
 0x132   :  { %217 = vrsqrt.f32 %v70_v41 }
 0x134   :  { %v212_v42 = vpop.eup %211 }
 0x135   :  { %v75_v43 = vmul.f32 %v212_v42, %v43_v12 }
 0x137   :  { %v86_v48 = vmul.f32 %v190_v44, %v75_v43 }
 0x138   :  { %v214_v45 = vpop.eup %213 }
 0x139   :  { %v216_v46 = vpop.eup %215  ;;  %v76_v47 = vmul.f32 %v214_v45, %v44_v20  ;;  %v97_v54 = vadd.f32 %v191_v50, %v86_v48 }
 0x13a   :  { %v77_v49 = vmul.f32 %v216_v46, %v45_v13 }
 0x13b   :  { %v87_v51 = vmul.f32 %v190_v44, %v76_v47 }
 0x13c   :  { %v218_v52 = vpop.eup %217  ;;  %v88_v56 = vmul.f32 %v190_v44, %v77_v49 }
 0x13d   :  { %v78_v53 = vmul.f32 %v218_v52, %v46_v21  ;;  %v98_v55 = vadd.f32 %v191_v50, %v87_v51 }
 0x13e   :  { %v99_v59 = vadd.f32 %v191_v50, %v88_v56 }
 0x13f   :  { %v101_v57 = vpack.c.bf16 %v98_v55, %v97_v54  ;;  %v89_v58 = vmul.f32 %v190_v44, %v78_v53 }
 0x141   :  { %205 = vmatprep.mubr.msk.bf16.mxu0 %vm25_vm0, %v101_v57  ;;  %v100_v60 = vadd.f32 %v191_v50, %v89_v58 }
 0x143   :  { %v102_v61 = vpack.c.bf16 %v100_v60, %v99_v59 }
 0x145   :  { %206 = vmatmul.mubr.msk.bf16.vlgmr.msra.gmra.mrb[0].mxu0 %vm25_vm0, %v102_v61 }
 0x218   :  { %v207_v63 = vpop.f32.mrb[0].mxu0 }
 0x219   :  { %v175_v0 = vadd.f32 %v207_v63, %v192_v62  ;;  %v166_v1 = vpop.f32.mrb[1].mxu0 }
 0x21a   :  { %v167_v2 = vadd.f32 %v192_v62, %v166_v1  ;;  %v208_v3 = vpop.f32.mrb[2].mxu0 }
 0x21b   :  { %184 = vst.msk [vmem:[%s303_s5 + $0x10] sm:$0xff] %vm181_vm1, %v175_v0  ;;  %v178_v4 = vadd.f32 %v208_v3, %v192_v62  ;;  %v169_v5 = vpop.f32.mrb[3].mxu0 }
 0x21c   :  { %182 = vst.msk [vmem:[%s303_s5] sm:$0xff] %vm181_vm1, %v167_v2  ;;  %v170_v6 = vadd.f32 %v192_v62, %v169_v5 }
 0x21d   :  { %185 = vst.msk [vmem:[%s303_s5 + $0x18] sm:$0xff] %vm181_vm1, %v178_v4 }
 0x21e   :  { %183 = vst.msk [vmem:[%s303_s5 + $0x8] sm:$0xff] %vm181_vm1, %v170_v6 }

// kernel: encoder_forward.3
= control target key start
LH: loop header
LB: loop body
LE: loop exit
PB: predicated region body
PF: predicated region fallthrough
CT: control target
= control target key end

     0   :  { %vm70_vm0 = vcmask 64512   ;;  %v871_v3 = vmov 0.0   ;;  %vm872_vm1 = vmmov 0   ;;  %s1078_s0 = inlined_call_operand.vmem [shape: f32[4,8,32], index: 0, kind: input, shape index: {}]   ;;  %s1079_s1 = inlined_call_operand.vmem [shape: f32[4,8,8], index: 1, kind: input, shape index: {}]   ;;  %s1080_s2 = inlined_call_operand.vmem [shape: f32[4,8,8], index: 2, kind: input, shape index: {}]   ;;  %s1081_s3 = inlined_call_operand.vmem [shape: f32[4,8,8], index: 3, kind: input, shape index: {}]   ;;  %s1082_s4 = inlined_call_operand.vmem [shape: f32[4,8,8], index: 4, kind: input, shape index: {}]   ;;  %s1083_s5 = inlined_call_operand.vmem [shape: bf16[4,8,32], index: 5, kind: input, shape index: {}]   ;;  %s1084_s6 = inlined_call_operand.vmem [shape: f32[1,32], index: 6, kind: input, shape index: {}]   ;;  %s1085_s7 = inlined_call_operand.hbm [shape: f32[8,32], index: 7, kind: output, shape index: {}]  }
   0x1   :  { %v54_v0 = vld [vmem:[%s1080_s2] sm:$0xff]  ;;  %v55_v1 = vld [vmem:[%s1080_s2 + $0x8] sm:$0xff]  ;;  %756 = vmatprep.subr.bf16.mxu0 %v871_v3  ;;  %762 = vmatprep.subr.bf16.mxu1 %v871_v3  ;;  %v56_v7 = vld [vmem:[%s1080_s2 + $0x10] sm:$0xff] }
   0x2   :  { %v42_v2 = vld [vmem:[%s1079_s1] sm:$0xff]  ;;  %v58_v4 = vpack.c.bf16 %v54_v0, %v54_v0  ;;  %v59_v5 = vpack.c.bf16 %v55_v1, %v55_v1  ;;  %v43_v6 = vld [vmem:[%s1079_s1 + $0x8] sm:$0xff]  ;;  %758 = vmatprep.mubr.msk.bf16.mxu0 %vm872_vm1, %v871_v3  ;;  %764 = vmatprep.mubr.msk.bf16.mxu1 %vm872_vm1, %v871_v3  ;;  %v57_v8 = vld [vmem:[%s1080_s2 + $0x18] sm:$0xff] }
   0x3   :  { %12 = vsyncpa [#allocation3], 0  ;;  %v46_v11 = vmul.f32 0.35355338, %v42_v2  ;;  %v47_v12 = vmul.f32 0.35355338, %v43_v6  ;;  %v60_v13 = vpack.c.bf16 %v56_v7, %v56_v7  ;;  %v61_v14 = vpack.c.bf16 %v57_v8, %v57_v8 }
   0x4   :  { %v75_v9 = vsel %vm70_vm0, %v58_v4, 0  ;;  %v121_v10 = vsel %vm70_vm0, %v59_v5, 0  ;;  %v44_v17 = vld [vmem:[%s1079_s1 + $0x10] sm:$0xff]  ;;  %v45_v18 = vld [vmem:[%s1079_s1 + $0x18] sm:$0xff]  ;;  %v62_v1 = vld [vmem:[%s1081_s3] sm:$0xff]  ;;  %vm314_vm2 = vcmask 1043456  }
   0x5   :  { %757 = vmatpush3.bf16.xpose.msra.mxu0 %v75_v9  ;;  %763 = vmatpush3.bf16.xpose.msra.mxu1 %v121_v10  ;;  %v50_v15 = vpack.c.bf16 %v46_v11, %v46_v11  ;;  %v51_v16 = vpack.c.bf16 %v47_v12, %v47_v12  ;;  %v167_v19 = vsel %vm70_vm0, %v60_v13, 0  ;;  %v213_v20 = vsel %vm70_vm0, %v61_v14, 0  ;;  %v63_v5 = vld [vmem:[%s1081_s3 + $0x8] sm:$0xff]  ;;  %v64_v11 = vld [vmem:[%s1081_s3 + $0x10] sm:$0xff]  ;;  %v299_v13 = vld [vmem:[%s1082_s4] sm:$0xff]  ;;  %s873_s20 = smov [#allocation2]  }
   0x6   :  { %768 = vmatprep.subr.bf16.mxu0 %v871_v3  ;;  %774 = vmatprep.subr.bf16.mxu1 %v871_v3  ;;  %v48_v21 = vmul.f32 0.35355338, %v44_v17  ;;  %v49_v22 = vmul.f32 0.35355338, %v45_v18  ;;  %v66_v2 = vpack.c.bf16 %v62_v1, %v62_v1  ;;  %v67_v6 = vpack.c.bf16 %v63_v5, %v63_v5  ;;  %v65_v17 = vld [vmem:[%s1081_s3 + $0x18] sm:$0xff]  ;;  %s711_s21 = sshll.u32 %s873_s20, 4  ;;  %s712_s21 = int_to_ptr.vmem [resolvable:$true] %s711_s21 }
   0x7   :  { %vm32_vm3 = vcmask 261120   ;;  %s847_s22 = scalar_lea.vmem %s712_s21, 128  ;;  %p852_p1 = scmp.lt.s32.totalorder %s712_s21, %s712_s21 }
   0x8   :  { %v52_v23 = vpack.c.bf16 %v48_v21, %v48_v21  ;;  %v53_v24 = vpack.c.bf16 %v49_v22, %v49_v22  ;;  %v316_v4 = vsel %vm314_vm2, %v66_v2, 0  ;;  %v362_v7 = vsel %vm314_vm2, %v67_v6, 0  ;;  %v28_v2 = vld [vmem:[%s1078_s0] sm:$0xff]  ;;  %v30_v6 = vld [vmem:[%s1078_s0 + $0x10] sm:$0xff]  ;;  %p848_p0 = scmp.ne.s32.totalorder %s712_s21, %s847_s22  ;;  %p853_p2 = scmp.lt.s32.totalorder %s847_s22, %s847_s22 }
   0xa   :  { %p854_p3 = por %p853_p2, %p852_p1 }
   0xc   :  { %759 = vmatmul.mubr.msk.bf16.vlgmr.msra.gmra.mrb[0].mxu0 %vm70_vm0, %v50_v15  ;;  %765 = vmatmul.mubr.msk.bf16.vlgmr.msra.gmra.mrb[0].mxu1 %vm70_vm0, %v51_v16  ;;  %v68_v16 = vpack.c.bf16 %v64_v11, %v64_v11  ;;  %p855_p4 = pnand %p854_p3, %p848_p0 }
   0xd   :  { %769 = vmatpush3.bf16.xpose.msra.mxu0 %v167_v19  ;;  %775 = vmatpush3.bf16.xpose.msra.mxu1 %v213_v20  ;;  %v300_v20 = vld [vmem:[%s1082_s4 + $0x8] sm:$0xff] }
   0xe   :  { %770 = vmatprep.mubr.msk.bf16.mxu0 %vm872_vm1, %v871_v3  ;;  %776 = vmatprep.mubr.msk.bf16.mxu1 %vm872_vm1, %v871_v3 }
   0xf   :  { %780 = vmatprep.subr.bf16.mxu0 %v871_v3  ;;  %786 = vmatprep.subr.bf16.mxu1 %v871_v3 }
  0x14   :  { %771 = vmatmul.mubr.msk.bf16.vlgmr.msra.gmra.mrb[4].mxu0 %vm70_vm0, %v52_v23  ;;  %777 = vmatmul.mubr.msk.bf16.vlgmr.msra.gmra.mrb[4].mxu1 %vm70_vm0, %v53_v24  ;;  %v408_v23 = vsel %vm314_vm2, %v68_v16, 0  ;;  %v69_v24 = vpack.c.bf16 %v65_v17, %v65_v17 }
  0x15   :  { %782 = vmatprep.mubr.msk.bf16.mxu0 %vm872_vm1, %v871_v3  ;;  %788 = vmatprep.mubr.msk.bf16.mxu1 %vm872_vm1, %v871_v3 }
  0x16   :  { %781 = vmatpush3.bf16.msra.mxu0 %v316_v4  ;;  %787 = vmatpush3.bf16.msra.mxu1 %v362_v7  ;;  %v33_v4 = vsel %vm32_vm3, %v28_v2, 0.0 }
  0x17   :  { %792 = vmatprep.subr.bf16.mxu0 %v871_v3  ;;  %798 = vmatprep.subr.bf16.mxu1 %v871_v3 }
  0xdf   :  { %v111_v25 = vpop.f32.mrb[0].mxu0  ;;  %v157_v26 = vpop.f32.mrb[0].mxu1 }
  0xe0   :  { %v760_v27 = vpop.f32.mrb[1].mxu0  ;;  %v255_v28 = vsel %vm70_vm0, %v111_v25, -inf  ;;  %v766_v29 = vpop.f32.mrb[1].mxu1  ;;  %v258_v34 = vsel %vm70_vm0, %v157_v26, -inf }
  0xe1   :  { %256 = vmax.xlane.f32.xlu0 %v255_v28  ;;  %v114_v30 = vpop.f32.mrb[2].mxu0  ;;  %v160_v31 = vpop.f32.mrb[2].mxu1  ;;  %v301_v27 = vld [vmem:[%s1082_s4 + $0x10] sm:$0xff] }
  0xe2   :  { %v761_v32 = vpop.f32.mrb[3].mxu0  ;;  %v767_v33 = vpop.f32.mrb[3].mxu1  ;;  %v454_v30 = vsel %vm314_vm2, %v69_v24, 0  ;;  %v500_v31 = vld [vmem:[%s1083_s5] sm:$0xf] }
  0xe5   :  { %259 = vmax.xlane.f32.xlu0 %v258_v34  ;;  %v302_v34 = vld [vmem:[%s1082_s4 + $0x18] sm:$0xff] }
  0xe7   :  { %v203_v35 = vpop.f32.mrb[4].mxu0  ;;  %v249_v36 = vpop.f32.mrb[4].mxu1 }
  0xe8   :  { %v772_v37 = vpop.f32.mrb[5].mxu0  ;;  %v261_v38 = vsel %vm70_vm0, %v203_v35, -inf  ;;  %v778_v39 = vpop.f32.mrb[5].mxu1  ;;  %v264_v44 = vsel %vm70_vm0, %v249_v36, -inf }
  0xe9   :  { %262 = vmax.xlane.f32.xlu1 %v261_v38  ;;  %v206_v40 = vpop.f32.mrb[6].mxu0  ;;  %v252_v41 = vpop.f32.mrb[6].mxu1  ;;  %v508_v37 = vsel %vm314_vm2, %v500_v31, 0 }
  0xea   :  { %v773_v42 = vpop.f32.mrb[7].mxu0  ;;  %v779_v43 = vpop.f32.mrb[7].mxu1  ;;  %v501_v40 = vld [vmem:[%s1083_s5 + $0x4] sm:$0xf] }
  0xeb   :  { %v554_v41 = vsel %vm314_vm2, %v501_v40, 0  ;;  %v502_v42 = vld [vmem:[%s1083_s5 + $0x8] sm:$0xf] }
  0xed   :  { %265 = vmax.xlane.f32.xlu1 %v264_v44 }
 0x16e   :  { %v257_v45 = vpop.xlane.xlu0 %256 }
 0x16f   :  { %v267_v46 = vsub.f32 %v111_v25, %v257_v45 }
 0x171   :  { %v271_v47 = vmul.f32 1.442695, %v267_v46  ;;  %v600_v46 = vsel %vm314_vm2, %v502_v42, 0 }
 0x172   :  { %v260_v48 = vpop.xlane.xlu0 %259 }
 0x173   :  { %831 = vpow2.f32 %v271_v47  ;;  %v268_v49 = vsub.f32 %v157_v26, %v260_v48  ;;  %v503_v48 = vld [vmem:[%s1083_s5 + $0xc] sm:$0xf] }
 0x175   :  { %v273_v50 = vmul.f32 1.442695, %v268_v49 }
 0x176   :  { %v263_v51 = vpop.xlane.xlu1 %262 }
 0x177   :  { %833 = vpow2.f32 %v273_v50  ;;  %v269_v52 = vsub.f32 %v203_v35, %v263_v51 }
 0x179   :  { %v275_v53 = vmul.f32 1.442695, %v269_v52 }
 0x17a   :  { %v266_v54 = vpop.xlane.xlu1 %265 }
 0x17b   :  { %835 = vpow2.f32 %v275_v53  ;;  %v270_v55 = vsub.f32 %v249_v36, %v266_v54  ;;  %v646_v53 = vsel %vm314_vm2, %v503_v48, 0 }
 0x17d   :  { %v832_v56 = vpop.eup %831  ;;  %v277_v57 = vmul.f32 1.442695, %v270_v55 }
 0x17e   :  { %v279_v58 = vsel %vm70_vm0, %v832_v56, 0.0 }
 0x17f   :  { %837 = vpow2.f32 %v277_v57  ;;  %280 = vadd.xlane.f32.xlu0 %v279_v58 }
 0x181   :  { %v834_v59 = vpop.eup %833 }
 0x182   :  { %v282_v60 = vsel %vm70_vm0, %v834_v59, 0.0 }
 0x183   :  { %283 = vadd.xlane.f32.xlu1 %v282_v60 }
 0x185   :  { %v836_v61 = vpop.eup %835 }
 0x186   :  { %v285_v62 = vsel %vm70_vm0, %v836_v61, 0.0 }
 0x187   :  { %286 = vadd.xlane.f32.xlu0 %v285_v62 }
 0x189   :  { %v838_v63 = vpop.eup %837 }
 0x18a   :  { %v288_v0 = vsel %vm70_vm0, %v838_v63, 0.0 }
 0x18b   :  { %289 = vadd.xlane.f32.xlu1 %v288_v0 }
 0x20c   :  { %v281_v8 = vpop.xlane.xlu0 %280 }
 0x20d   :  { %839 = vrcp.f32 %v281_v8 }
 0x210   :  { %v284_v9 = vpop.xlane.xlu1 %283 }
 0x211   :  { %841 = vrcp.f32 %v284_v9 }
 0x214   :  { %v287_v10 = vpop.xlane.xlu0 %286 }
 0x215   :  { %843 = vrcp.f32 %v287_v10  ;;  %v36_v10 = vsel %vm32_vm3, %v30_v6, 0.0 }
 0x217   :  { %v840_v12 = vpop.eup %839 }
 0x218   :  { %v295_v14 = vmul.f32 %v840_v12, %v832_v56  ;;  %v290_v15 = vpop.xlane.xlu1 %289  ;;  %v31_v12 = vld [vmem:[%s1078_s0 + $0x18] sm:$0xff] }
 0x219   :  { %845 = vrcp.f32 %v290_v15 }
 0x21a   :  { %v303_v18 = vadd.f32 %v299_v13, %v295_v14 }
 0x21b   :  { %v842_v19 = vpop.eup %841 }
 0x21c   :  { %v296_v21 = vmul.f32 %v842_v19, %v834_v59  ;;  %v307_v22 = vpack.c.bf16 %v303_v18, %v303_v18  ;;  %v38_v19 = vsel %vm32_vm3, %v31_v12, 0.0 }
 0x21e   :  { %783 = vmatmul.mubr.msk.bf16.vlgmr.msra.gmra.mrb[8].mxu0 %vm70_vm0, %v307_v22  ;;  %v304_v25 = vadd.f32 %v300_v20, %v296_v21 }
 0x21f   :  { %v844_v26 = vpop.eup %843  ;;  %793 = vmatpush3.bf16.msra.mxu0 %v408_v23  ;;  %794 = vmatprep.mubr.msk.bf16.mxu0 %vm872_vm1, %v871_v3 }
 0x220   :  { %v297_v28 = vmul.f32 %v844_v26, %v836_v61  ;;  %v308_v29 = vpack.c.bf16 %v304_v25, %v304_v25  ;;  %804 = vmatprep.subr.bf16.mxu0 %v871_v3 }
 0x222   :  { %789 = vmatmul.mubr.msk.bf16.vlgmr.msra.gmra.mrb[8].mxu1 %vm70_vm0, %v308_v29  ;;  %v305_v32 = vadd.f32 %v301_v27, %v297_v28 }
 0x223   :  { %v846_v33 = vpop.eup %845  ;;  %799 = vmatpush3.bf16.msra.mxu1 %v454_v30  ;;  %800 = vmatprep.mubr.msk.bf16.mxu1 %vm872_vm1, %v871_v3 }
 0x224   :  { %v298_v35 = vmul.f32 %v846_v33, %v838_v63  ;;  %v309_v36 = vpack.c.bf16 %v305_v32, %v305_v32  ;;  %810 = vmatprep.subr.bf16.mxu1 %v871_v3 }
 0x226   :  { %795 = vmatmul.mubr.msk.bf16.vlgmr.msra.gmra.mrb[12].mxu0 %vm70_vm0, %v309_v36  ;;  %v306_v38 = vadd.f32 %v302_v34, %v298_v35 }
 0x227   :  { %805 = vmatpush3.bf16.msra.mxu0 %v508_v37  ;;  %806 = vmatprep.mubr.msk.bf16.mxu0 %vm872_vm1, %v871_v3  ;;  %v731_v37 = vld [vmem:[%s1084_s6] ss:$0 sm:$0xff] }
 0x228   :  { %v310_v39 = vpack.c.bf16 %v306_v38, %v306_v38  ;;  %816 = vmatprep.subr.bf16.mxu0 %v871_v3 }
 0x22a   :  { %801 = vmatmul.mubr.msk.bf16.vlgmr.msra.gmra.mrb[12].mxu1 %vm70_vm0, %v310_v39 }
 0x22b   :  { %812 = vmatprep.mubr.msk.bf16.mxu1 %vm872_vm1, %v871_v3  ;;  %811 = vmatpush3.bf16.msra.mxu1 %v554_v41 }
 0x22c   :  { %822 = vmatprep.subr.bf16.mxu1 %v871_v3 }
 0x2f1   :  { %v352_v43 = vpop.f32.mrb[8].mxu0 }
 0x2f2   :  { %v496_v44 = vpack.c.bf16 %v352_v43, %v352_v43  ;;  %v784_v45 = vpop.f32.mrb[9].mxu0 }
 0x2f3   :  { %v355_v47 = vpop.f32.mrb[10].mxu0 }
 0x2f4   :  { %v785_v49 = vpop.f32.mrb[11].mxu0  ;;  %807 = vmatmul.mubr.msk.bf16.vlgmr.msra.gmra.mrb[16].mxu0 %vm70_vm0, %v496_v44 }
 0x2f5   :  { %v398_v50 = vpop.f32.mrb[8].mxu1  ;;  %817 = vmatpush3.bf16.msra.mxu0 %v600_v46  ;;  %818 = vmatprep.mubr.msk.bf16.mxu0 %vm872_vm1, %v871_v3 }
 0x2f6   :  { %v497_v51 = vpack.c.bf16 %v398_v50, %v398_v50  ;;  %v790_v52 = vpop.f32.mrb[9].mxu1 }
 0x2f7   :  { %v401_v54 = vpop.f32.mrb[10].mxu1 }
 0x2f8   :  { %v791_v55 = vpop.f32.mrb[11].mxu1  ;;  %813 = vmatmul.mubr.msk.bf16.vlgmr.msra.gmra.mrb[16].mxu1 %vm70_vm0, %v497_v51 }
 0x2f9   :  { %v444_v56 = vpop.f32.mrb[12].mxu0  ;;  %823 = vmatpush3.bf16.msra.mxu1 %v646_v53  ;;  %824 = vmatprep.mubr.msk.bf16.mxu1 %vm872_vm1, %v871_v3  ;;  %v29_v3 = vld [vmem:[%s1078_s0 + $0x8] sm:$0xff] }
 0x2fa   :  { %v498_v57 = vpack.c.bf16 %v444_v56, %v444_v56  ;;  %v796_v58 = vpop.f32.mrb[13].mxu0  ;;  %v34_v5 = vsel %vm32_vm3, %v29_v3, 0.0 }
 0x2fb   :  { %v447_v59 = vpop.f32.mrb[14].mxu0  ;;  %v35_v8 = vadd.f32 %v34_v5, %v33_v4 }
 0x2fc   :  { %v797_v60 = vpop.f32.mrb[15].mxu0  ;;  %819 = vmatmul.mubr.msk.bf16.vlgmr.msra.gmra.mrb[20].mxu0 %vm70_vm0, %v498_v57 }
 0x2fd   :  { %v490_v61 = vpop.f32.mrb[12].mxu1  ;;  %v37_v15 = vadd.f32 %v36_v10, %v35_v8 }
 0x2fe   :  { %v499_v62 = vpack.c.bf16 %v490_v61, %v490_v61  ;;  %v802_v63 = vpop.f32.mrb[13].mxu1 }
 0x2ff   :  { %v493_v0 = vpop.f32.mrb[14].mxu1  ;;  %v39_v24 = vadd.f32 %v38_v19, %v37_v15 }
 0x300   :  { %v803_v1 = vpop.f32.mrb[15].mxu1  ;;  %825 = vmatmul.mubr.msk.bf16.vlgmr.msra.gmra.mrb[20].mxu1 %vm70_vm0, %v499_v62 }
 0x301   :  { %v41_v30 = vmul.f32 0.25, %v39_v24 }
 0x3c7   :  { %v544_v7 = vpop.f32.mrb[16].mxu0 }
 0x3c8   :  { %v808_v9 = vpop.f32.mrb[17].mxu0  ;;  %v688_v16 = vsel %vm32_vm3, %v544_v7, 0.0 }
 0x3c9   :  { %v547_v11 = vpop.f32.mrb[18].mxu0 }
 0x3ca   :  { %v809_v13 = vpop.f32.mrb[19].mxu0 }
 0x3cb   :  { %v590_v14 = vpop.f32.mrb[16].mxu1 }
 0x3cc   :  { %v689_v17 = vsel %vm32_vm3, %v590_v14, 0.0  ;;  %v814_v18 = vpop.f32.mrb[17].mxu1 }
 0x3cd   :  { %v690_v20 = vadd.f32 %v689_v17, %v688_v16  ;;  %v593_v21 = vpop.f32.mrb[18].mxu1 }
 0x3ce   :  { %v815_v22 = vpop.f32.mrb[19].mxu1 }
 0x3cf   :  { %v636_v23 = vpop.f32.mrb[20].mxu0 }
 0x3d0   :  { %v691_v25 = vsel %vm32_vm3, %v636_v23, 0.0  ;;  %v820_v26 = vpop.f32.mrb[21].mxu0 }
 0x3d1   :  { %v692_v27 = vadd.f32 %v691_v25, %v690_v20  ;;  %v639_v28 = vpop.f32.mrb[22].mxu0 }
 0x3d2   :  { %v821_v29 = vpop.f32.mrb[23].mxu0 }
 0x3d3   :  { %v682_v31 = vpop.f32.mrb[20].mxu1 }
 0x3d4   :  { %v693_v32 = vsel %vm32_vm3, %v682_v31, 0.0  ;;  %v826_v33 = vpop.f32.mrb[21].mxu1 }
 0x3d5   :  { %v694_v34 = vadd.f32 %v693_v32, %v692_v27  ;;  %v685_v35 = vpop.f32.mrb[22].mxu1 }
 0x3d6   :  { %v827_v36 = vpop.f32.mrb[23].mxu1 }
 0x3d7   :  { %v695_v38 = vadd.f32 %v694_v34, %v41_v30 }
 0x3d9   :  { %v703_v39 = vadd.f32 %v731_v37, %v695_v38 }
 0x3db   :  { %704 = vst.msk [vmem:[#allocation2] sm:$0xff] %vm32_vm3, %v703_v39 }
 0x3dc   :  { %858 = shalt.err (!%p855_p4)
}
 0x3dd   :  { %s859_s25 = scalar_lea.hbm %s1085_s7, 128 }
 0x3de   :  { %p860_p5 = scmp.ne.s32.totalorder %s1085_s7, %s859_s25  ;;  %p863_p6 = scmp.lt.u32.totalorder %s859_s25, %s1085_s7 }
 0x3e0   :  { %p865_p7 = pnand %p863_p6, %p860_p5 }
 0x3e2   :  { %868 = shalt.err (!%p865_p7)
}
 0x3e3   :  { %714 = dma.vmem_to_hbm [thread:$0]  %s712_s21, 128, %s1085_s7, [#allocation3]  }
 0x3e4   :  { %869 = dma.done.wait [#allocation3], 128  }
 0x3e5   :  { %870 = vsyncadd [#allocation3], 4294967168 }
 0x3e6   :  { %718 = vsyncpa [#allocation3], 1 }

</bundles_post_ra>
